<compile_context>
chip_gen: v6e
topology: v6e:2x2x1
jax: 0.10.0
libtpu: 0.0.40
codegen_flags: <defaults>
</compile_context>

<pallas_src>
import jax
import jax.numpy as jnp
from jax.experimental import pallas as pl
from jax.experimental.pallas import tpu as pltpu


def _round_up(n, m):
    return ((n + m - 1) // m) * m


def dqn_kernel(x_ref, w1_ref, w2_ref, w3_ref, w4_ref, o_ref):
    # Fused 4-layer bias-free MLP for one batch tile.  Weights arrive
    # pre-transposed ([in, out]) and already bf16, so every layer is a plain
    # bf16 MXU matmul with an f32 accumulator; tanh runs on the EUP in f32
    # and the result is narrowed to bf16 only to feed the next matmul.
    h = x_ref[...].astype(jnp.bfloat16)
    h = jnp.tanh(
        jnp.dot(h, w1_ref[...], preferred_element_type=jnp.float32)
    ).astype(jnp.bfloat16)
    h = jnp.tanh(
        jnp.dot(h, w2_ref[...], preferred_element_type=jnp.float32)
    ).astype(jnp.bfloat16)
    h = jnp.tanh(
        jnp.dot(h, w3_ref[...], preferred_element_type=jnp.float32)
    ).astype(jnp.bfloat16)
    o_ref[...] = jnp.tanh(
        jnp.dot(h, w4_ref[...], preferred_element_type=jnp.float32)
    ).astype(o_ref.dtype)


def dqn_forward(x, w1t, w2t, w3t, w4t, *, batch_tile=512):
    """x: [B, F] float32; w_it: pre-transposed [in, out] bfloat16 weights."""
    B, F = x.shape
    H1 = w1t.shape[1]
    H2 = w2t.shape[1]
    H3 = w3t.shape[1]
    C = w4t.shape[1]

    if B <= 128:
        # Single whole-batch tile for small online/action-selection batches.
        tb = B
    else:
        # Keep >= 2 grid steps (v7x megacore) while amortizing per-step
        # overhead with tiles up to `batch_tile`; multiple of 8 sublanes.
        tb = min(batch_tile, max(8, _round_up(pl.cdiv(B, 2), 8)))
    grid = (pl.cdiv(B, tb),)

    # Advisory cost hint for XLA's scheduler around this custom call.
    flops = 2 * B * (F * H1 + H1 * H2 + H2 * H3 + H3 * C)
    transcendentals = B * (H1 + H2 + H3 + C)
    bytes_accessed = (
        4 * B * F + 4 * B * C
        + 2 * (F * H1 + H1 * H2 + H2 * H3 + H3 * C)  # bf16 weights
    )

    def w_spec(shape):
        # Full weight block, same block index at every grid step -> stays
        # resident in VMEM across batch tiles (DMA'd once).
        return pl.BlockSpec(shape, lambda i: (0, 0))

    return pl.pallas_call(
        dqn_kernel,
        out_shape=jax.ShapeDtypeStruct((B, C), jnp.float32),
        grid=grid,
        in_specs=[
            pl.BlockSpec((tb, F), lambda i: (i, 0)),
            w_spec(w1t.shape),
            w_spec(w2t.shape),
            w_spec(w3t.shape),
            w_spec(w4t.shape),
        ],
        out_specs=pl.BlockSpec((tb, C), lambda i: (i, 0)),
        compiler_params=pltpu.CompilerParams(
            dimension_semantics=("parallel",),
        ),
        cost_estimate=pl.CostEstimate(
            flops=flops,
            transcendentals=transcendentals,
            bytes_accessed=bytes_accessed,
        ),
    )(x, w1t, w2t, w3t, w4t)


def init_params(key, state_feature_count, control_output_count):
    """Deterministic init mirroring nn.Linear default U(-1/sqrt(fan_in), +1/sqrt(fan_in)).

    Returns PyTorch-layout [out, in] float32 weights.
    """
    layers = [state_feature_count, 81, 243, 81, control_output_count]
    ws = []
    for i in range(4):
        key, sub = jax.random.split(key)
        fan_in, fan_out = layers[i], layers[i + 1]
        bound = 1.0 / jnp.sqrt(fan_in)
        ws.append(
            jax.random.uniform(
                sub, (fan_out, fan_in), dtype=jnp.float32,
                minval=-bound, maxval=bound,
            )
        )
    return ws


def prepare_params(ws):
    """One-time conversion: PyTorch [out, in] f32 -> kernel [in, out] bf16."""
    return [jnp.asarray(w.T, dtype=jnp.bfloat16) for w in ws]


if __name__ == "__main__":
    key = jax.random.PRNGKey(0)
    state_feature_count = 16
    control_output_count = 4

    kx, kp, kx2 = jax.random.split(key, 3)
    ws = init_params(kp, state_feature_count, control_output_count)
    wts = prepare_params(ws)  # done once, persists across calls

    def ref_forward(x):
        # Pure-JAX f32 reference of the PyTorch module.
        h = x
        for w in ws:
            h = jnp.tanh(h @ w.T)
        return h

    def check(x):
        out = jax.block_until_ready(dqn_forward(x, *wts))
        ref = ref_forward(x)
        assert out.shape == ref.shape
        assert jnp.allclose(out, ref, atol=3e-2, rtol=3e-2)
        # Action-selection agreement (what DQN consumes online), gated on the
        # reference top-2 margin being resolvable at bf16 precision.
        top2 = jnp.sort(ref, axis=-1)[:, -2:]
        margin = top2[:, 1] - top2[:, 0]
        agree = jnp.argmax(out, axis=-1) == jnp.argmax(ref, axis=-1)
        assert bool(jnp.all(jnp.where(margin > 5e-2, agree, True)))

    # Small online/action-selection batch: single whole-batch tile.
    x_small = jax.random.normal(kx, (8, state_feature_count), dtype=jnp.float32)
    check(x_small)

    # Replay-style batch: exercises the tiled path (grid of 2, ragged last tile).
    x_big = jax.random.normal(kx2, (300, state_feature_count), dtype=jnp.float32)
    check(x_big)

    print("KERNEL_OK")
</pallas_src>

<mosaic_0001>
module attributes {stable_mosaic.version = 11 : i64} {
  func.func @dqn_kernel(%arg0: i32, %arg1: memref<8x16xf32, #tpu.memory_space<vmem>>, %arg2: memref<16x81xbf16, #tpu.memory_space<vmem>>, %arg3: memref<81x243xbf16, #tpu.memory_space<vmem>>, %arg4: memref<243x81xbf16, #tpu.memory_space<vmem>>, %arg5: memref<81x4xbf16, #tpu.memory_space<vmem>>, %arg6: memref<8x4xf32, #tpu.memory_space<vmem>>) attributes {dimension_semantics = [#tpu.dimension_semantics<parallel>], iteration_bounds = array<i64: 1>, scalar_prefetch = 0 : i64, scratch_operands = 0 : i64, tpu.core_type = #tpu.core_type<tc>, window_params = [{transform_indices = @transform_0, window_bounds = array<i64: 8, 16>}, {pipeline_mode = #tpu.pipeline_mode<synchronous>, transform_indices = @transform_1, window_bounds = array<i64: 16, 81>}, {pipeline_mode = #tpu.pipeline_mode<synchronous>, transform_indices = @transform_2, window_bounds = array<i64: 81, 243>}, {pipeline_mode = #tpu.pipeline_mode<synchronous>, transform_indices = @transform_3, window_bounds = array<i64: 243, 81>}, {pipeline_mode = #tpu.pipeline_mode<synchronous>, transform_indices = @transform_4, window_bounds = array<i64: 81, 4>}, {transform_indices = @transform_5, window_bounds = array<i64: 8, 4>}]} {
    %c0 = arith.constant 0 : index
    %c0_0 = arith.constant 0 : index
    %0 = vector.load %arg1[%c0, %c0_0] : memref<8x16xf32, #tpu.memory_space<vmem>>, vector<8x16xf32>
    %1 = arith.truncf %0 : vector<8x16xf32> to vector<8x16xbf16>
    %c0_1 = arith.constant 0 : index
    %c0_2 = arith.constant 0 : index
    %2 = vector.load %arg2[%c0_1, %c0_2] : memref<16x81xbf16, #tpu.memory_space<vmem>>, vector<16x81xbf16>
    %cst = arith.constant dense<0.000000e+00> : vector<8x81xf32>
    %3 = tpu.matmul %1, %2, %cst {dimension_numbers = #tpu.dot_dimension_numbers<[1], [0], [0], [1], [0, 0, 1, 1], [], []>} : vector<8x16xbf16>, vector<16x81xbf16>, vector<8x81xf32> -> vector<8x81xf32>
    %4 = math.tanh %3 : vector<8x81xf32>
    %5 = arith.truncf %4 : vector<8x81xf32> to vector<8x81xbf16>
    %c0_3 = arith.constant 0 : index
    %c0_4 = arith.constant 0 : index
    %6 = vector.load %arg3[%c0_3, %c0_4] : memref<81x243xbf16, #tpu.memory_space<vmem>>, vector<81x243xbf16>
    %cst_5 = arith.constant dense<0.000000e+00> : vector<8x243xf32>
    %7 = tpu.matmul %5, %6, %cst_5 {dimension_numbers = #tpu.dot_dimension_numbers<[1], [0], [0], [1], [0, 0, 1, 1], [], []>} : vector<8x81xbf16>, vector<81x243xbf16>, vector<8x243xf32> -> vector<8x243xf32>
    %8 = math.tanh %7 : vector<8x243xf32>
    %9 = arith.truncf %8 : vector<8x243xf32> to vector<8x243xbf16>
    %c0_6 = arith.constant 0 : index
    %c0_7 = arith.constant 0 : index
    %10 = vector.load %arg4[%c0_6, %c0_7] : memref<243x81xbf16, #tpu.memory_space<vmem>>, vector<243x81xbf16>
    %cst_8 = arith.constant dense<0.000000e+00> : vector<8x81xf32>
    %11 = tpu.matmul %9, %10, %cst_8 {dimension_numbers = #tpu.dot_dimension_numbers<[1], [0], [0], [1], [0, 0, 1, 1], [], []>} : vector<8x243xbf16>, vector<243x81xbf16>, vector<8x81xf32> -> vector<8x81xf32>
    %12 = math.tanh %11 : vector<8x81xf32>
    %13 = arith.truncf %12 : vector<8x81xf32> to vector<8x81xbf16>
    %c0_9 = arith.constant 0 : index
    %c0_10 = arith.constant 0 : index
    %14 = vector.load %arg5[%c0_9, %c0_10] : memref<81x4xbf16, #tpu.memory_space<vmem>>, vector<81x4xbf16>
    %cst_11 = arith.constant dense<0.000000e+00> : vector<8x4xf32>
    %15 = tpu.matmul %13, %14, %cst_11 {dimension_numbers = #tpu.dot_dimension_numbers<[1], [0], [0], [1], [0, 0, 1, 1], [], []>} : vector<8x81xbf16>, vector<81x4xbf16>, vector<8x4xf32> -> vector<8x4xf32>
    %16 = math.tanh %15 : vector<8x4xf32>
    %c0_12 = arith.constant 0 : index
    %c0_13 = arith.constant 0 : index
    %17 = vector.load %arg6[%c0_12, %c0_13] : memref<8x4xf32, #tpu.memory_space<vmem>>, vector<8x4xf32>
    tpu.vector_store %arg6[%c0_12, %c0_13], %16 {strides = array<i32>} : memref<8x4xf32, #tpu.memory_space<vmem>>, vector<8x4xf32>,
    return
  }
  func.func @transform_0(%arg0: i32) -> (i32, i32) {
    %c0_i32 = arith.constant 0 : i32
    %c0_i32_0 = arith.constant 0 : i32
    return %arg0, %c0_i32 : i32, i32
  }
  func.func @transform_1(%arg0: i32) -> (i32, i32) {
    %c0_i32 = arith.constant 0 : i32
    %c0_i32_0 = arith.constant 0 : i32
    %c0_i32_1 = arith.constant 0 : i32
    return %c0_i32, %c0_i32_0 : i32, i32
  }
  func.func @transform_2(%arg0: i32) -> (i32, i32) {
    %c0_i32 = arith.constant 0 : i32
    %c0_i32_0 = arith.constant 0 : i32
    %c0_i32_1 = arith.constant 0 : i32
    return %c0_i32, %c0_i32_0 : i32, i32
  }
  func.func @transform_3(%arg0: i32) -> (i32, i32) {
    %c0_i32 = arith.constant 0 : i32
    %c0_i32_0 = arith.constant 0 : i32
    %c0_i32_1 = arith.constant 0 : i32
    return %c0_i32, %c0_i32_0 : i32, i32
  }
  func.func @transform_4(%arg0: i32) -> (i32, i32) {
    %c0_i32 = arith.constant 0 : i32
    %c0_i32_0 = arith.constant 0 : i32
    %c0_i32_1 = arith.constant 0 : i32
    return %c0_i32, %c0_i32_0 : i32, i32
  }
  func.func @transform_5(%arg0: i32) -> (i32, i32) {
    %c0_i32 = arith.constant 0 : i32
    %c0_i32_0 = arith.constant 0 : i32
    return %arg0, %c0_i32 : i32, i32
  }
}

</mosaic_0001>

<bundles_post_ra>
// kernel: tpu_custom_call.1
= control target key start
LH: loop header
LB: loop body
LE: loop exit
PB: predicated region body
PF: predicated region fallthrough
CT: control target
= control target key end

     0   :  { %vm147_vm0 = vcmask 1040384   ;;  %v620_v0 = vmov 0.0   ;;  %vm621_vm1 = vmmov 0   ;;  %v622_v4 = vmov 0   ;;  %s777_s1 = inlined_call_operand.vmem [shape: bf16[16,81], index: 1, kind: input, shape index: {}]   ;;  %s778_s0 = inlined_call_operand.vmem [shape: f32[8,16], index: 0, kind: input, shape index: {}]   ;;  %s779_s2 = inlined_call_operand.vmem [shape: bf16[81,243], index: 2, kind: input, shape index: {}]   ;;  %s780_s4 = inlined_call_operand.vmem [shape: bf16[81,4], index: 4, kind: input, shape index: {}]   ;;  %s781_s3 = inlined_call_operand.vmem [shape: bf16[243,81], index: 3, kind: input, shape index: {}]   ;;  %s782_s5 = inlined_call_operand.vmem [shape: f32[8,4], index: 5, kind: output, shape index: {}]  }
   0x1   :  { %544 = vmatprep.subr.bf16.mxu0 %v620_v0  ;;  %v570_v1 = vld [vmem:[%s777_s1] sm:$0xff]   ;;  %546 = vmatprep.mubr.msk.bf16.mxu0 %vm621_vm1, %v620_v0  ;;  %v87_v3 = vld [vmem:[%s779_s2 + $0x50] sm:$0x11]  ;;  %v149_v5 = vsel %vm147_vm0, 65535, %v622_v4  ;;  %vm31_vm2 = vcmask 130048   ;;  %v623_v21 = vmov 65535  }
   0x2   :  { %v21_v2 = vld [vmem:[%s778_s0] sm:$0xff]  ;;  %188 = vmatprep.mubr.bf16.mxu1 %v622_v4  ;;  %545 = vmatpush3.bf16.msra.mxu0 %v570_v1  ;;  %v487_v7 = vcombine.high %v87_v3, %v87_v3  ;;  %v486_v8 = vcombine.low %v87_v3, %v87_v3  ;;  %v577_v13 = vld [vmem:[%s779_s2 + $0x34] ss:$8 sps:$4 sm:$0xff]   ;;  %v579_v14 = vld [vmem:[%s779_s2 + $0x30] ss:$8 sps:$4 sm:$0xff]   ;;  %v330_v22 = vsel %vm147_vm0, 4294967295, %v623_v21 }
   0x3   :  { %v22_v6 = vpack.c.bf16 %v21_v2, %v21_v2  ;;  %v574_v9 = vld [vmem:[%s779_s2 + $0x44] ss:$8 sps:$4 sm:$0xff]   ;;  %v576_v12 = vld [vmem:[%s779_s2 + $0x40] ss:$8 sps:$4 sm:$0xff]   ;;  %v583_v17 = vld [vmem:[%s779_s2 + $0x14] ss:$8 sps:$4 sm:$0xff]  }
   0x4   :  { %v154_v10 = vand.u32 %v487_v7, %v149_v5  ;;  %v151_v11 = vand.u32 %v486_v8, %v149_v5  ;;  %v580_v15 = vld [vmem:[%s779_s2 + $0x24] ss:$8 sps:$4 sm:$0xff]   ;;  %v582_v16 = vld [vmem:[%s779_s2 + $0x20] ss:$8 sps:$4 sm:$0xff]   ;;  %v585_v18 = vld [vmem:[%s779_s2 + $0x10] ss:$8 sps:$4 sm:$0xff]  }
   0x5   :  { %547 = vmatmul.mubr.msk.bf16.vlgmr.msra.gmra.mxu0 %vm31_vm2, %v22_v6  ;;  %v586_v19 = vld [vmem:[%s779_s2 + $0x4] ss:$8 sps:$4 sm:$0xff]   ;;  %v588_v20 = vld [vmem:[%s779_s2] ss:$8 sps:$4 sm:$0xff]   ;;  %vm329_vm3 = vcmask 1041408   ;;  %v590_v25 = vld [vmem:[%s781_s3 + $0x38] sm:$0xff]  }
   0x6   :  { %160 = vmatprep.subr.bf16.mxu1 %v154_v10  ;;  %v589_v23 = vld [vmem:[%s781_s3 + $0x78] ss:$0 sps:$4 sm:$0x33]   ;;  %v331_v24 = vsel %vm329_vm3, %v330_v22, 0  ;;  %v591_v27 = vld [vmem:[%s781_s3 + $0x70] sm:$0xff]   ;;  %v593_v29 = vld [vmem:[%s781_s3 + $0x68] sm:$0xff]  }
   0x7   :  { %161 = vmatpush1.bf16.msra.mxu1 %v151_v11  ;;  %v333_v26 = vand.u32 %v589_v23, %v331_v24  ;;  %v592_v28 = vld [vmem:[%s781_s3 + $0x30] sm:$0xff]   ;;  %v594_v30 = vld [vmem:[%s781_s3 + $0x28] sm:$0xff]   ;;  %vm143_vm4 = vcmask 662528   ;;  %v595_v39 = vld [vmem:[%s781_s3 + $0x60] sm:$0xff]   ;;  %vm325_vm5 = vcmask 941056   ;;  %vm468_vm6 = vcmask 31744  }
   0x8   :  { %162 = vmatprep.subr.bf16.mxu1 %v574_v9  ;;  %v572_v35 = vld [vmem:[%s780_s4 + $0x28] ss:$0 sps:$4 sm:$0x11]   ;;  %v596_v40 = vld [vmem:[%s781_s3 + $0x20] sm:$0xff]   ;;  %v597_v41 = vld [vmem:[%s781_s3 + $0x58] sm:$0xff]  }
   0x9   :  { %515 = vmatprep.subr.bf16.mxu0 %v333_v26  ;;  %v425_v37 = vand.u32 %v572_v35, %v149_v5  ;;  %v598_v42 = vld [vmem:[%s781_s3 + $0x18] sm:$0xff]   ;;  %v599_v43 = vld [vmem:[%s781_s3 + $0x50] sm:$0xff]   ;;  %v601_v45 = vld [vmem:[%s781_s3 + $0x48] sm:$0xff]  }
   0xa   :  { %516 = vmatpush3.bf16.msra.mxu0 %v590_v25  ;;  %v600_v44 = vld [vmem:[%s781_s3 + $0x10] sm:$0xff]   ;;  %v602_v46 = vld [vmem:[%s781_s3 + $0x8] sm:$0xff]   ;;  %v603_v47 = vld [vmem:[%s781_s3 + $0x40] sm:$0xff]  }
   0xb   :  { %163 = vmatpush1.bf16.msra.mxu1 %v576_v12  ;;  %517 = vmatprep.subr.bf16.mxu0 %v591_v27  ;;  %v604_v48 = vld [vmem:[%s781_s3] sm:$0xff]   ;;  %v606_v58 = vld [vmem:[%s780_s4 + $0x18] sm:$0xff]   ;;  %v607_v59 = vld [vmem:[%s780_s4 + $0x10] sm:$0xff]  }
   0xc   :  { %164 = vmatprep.subr.bf16.mxu1 %v577_v13  ;;  %v605_v57 = vld [vmem:[%s780_s4 + $0x20] sm:$0xff]   ;;  %v608_v60 = vld [vmem:[%s780_s4 + $0x8] sm:$0xff]  }
   0xd   :  { %v609_v61 = vld [vmem:[%s780_s4] sm:$0xff]  }
   0xe   :  { %518 = vmatpush3.bf16.msra.mxu0 %v592_v28 }
   0xf   :  { %165 = vmatpush1.bf16.msra.mxu1 %v579_v14  ;;  %519 = vmatprep.subr.bf16.mxu0 %v593_v29 }
  0x10   :  { %166 = vmatprep.subr.bf16.mxu1 %v580_v15 }
  0x12   :  { %520 = vmatpush3.bf16.msra.mxu0 %v594_v30 }
  0x13   :  { %167 = vmatpush1.bf16.msra.mxu1 %v582_v16  ;;  %521 = vmatprep.subr.bf16.mxu0 %v595_v39 }
  0x14   :  { %168 = vmatprep.subr.bf16.mxu1 %v583_v17 }
  0x16   :  { %522 = vmatpush3.bf16.msra.mxu0 %v596_v40 }
  0x17   :  { %169 = vmatpush1.bf16.msra.mxu1 %v585_v18  ;;  %523 = vmatprep.subr.bf16.mxu0 %v597_v41 }
  0x18   :  { %170 = vmatprep.subr.bf16.mxu1 %v586_v19 }
  0x1a   :  { %524 = vmatpush3.bf16.msra.mxu0 %v598_v42 }
  0x1b   :  { %171 = vmatpush1.bf16.msra.mxu1 %v588_v20  ;;  %525 = vmatprep.subr.bf16.mxu0 %v599_v43 }
  0x1c   :  { %550 = vmatprep.subr.bf16.mxu1 %v620_v0 }
  0x1e   :  { %526 = vmatpush3.bf16.msra.mxu0 %v600_v44 }
  0x1f   :  { %527 = vmatprep.subr.bf16.mxu0 %v601_v45 }
  0x22   :  { %528 = vmatpush3.bf16.msra.mxu0 %v602_v46 }
  0x23   :  { %529 = vmatprep.subr.bf16.mxu0 %v603_v47 }
  0x26   :  { %530 = vmatpush3.bf16.msra.mxu0 %v604_v48 }
  0xc5   :  { %v69_v31 = vpop.f32.mrf.mxu0 }
  0xc6   :  { %610 = vtanh.f32 %v69_v31 }
  0xc7   :  { %v548_v32 = vpop.f32.mrf.mxu0 }
  0xc9   :  { %v72_v33 = vpop.f32.mrf.mxu0 }
  0xcb   :  { %v549_v34 = vpop.f32.mrf.mxu0 }
  0xd3   :  { %v611_v36 = vpop.eup %610 }
  0xd4   :  { %v76_v38 = vpack.c.bf16 %v611_v36, %v611_v36 }
  0xd6   :  { %488 = vmatmul.mubr.msk.bf16.vlgmr.msra.gmra.mxu1 %vm143_vm4, %v76_v38 }
  0xd7   :  { %551 = vmatpush3.bf16.msra.mxu1 %v425_v37  ;;  %562 = vmatprep.mubr.msk.bf16.mxu1 %vm621_vm1, %v620_v0 }
  0xd8   :  { %552 = vmatprep.subr.bf16.mxu1 %v620_v0 }
  0xdb   :  { %553 = vmatpush3.bf16.msra.mxu1 %v605_v57 }
  0xdc   :  { %554 = vmatprep.subr.bf16.mxu1 %v620_v0 }
  0xdf   :  { %555 = vmatpush3.bf16.msra.mxu1 %v606_v58 }
  0xe0   :  { %556 = vmatprep.subr.bf16.mxu1 %v620_v0 }
  0xe3   :  { %557 = vmatpush3.bf16.msra.mxu1 %v607_v59 }
  0xe4   :  { %558 = vmatprep.subr.bf16.mxu1 %v620_v0 }
  0xe7   :  { %559 = vmatpush3.bf16.msra.mxu1 %v608_v60 }
  0xe8   :  { %560 = vmatprep.subr.bf16.mxu1 %v620_v0 }
  0xeb   :  { %561 = vmatpush3.bf16.msra.mxu1 %v609_v61 }
 0x196   :  { %v190_v49 = vpop.f32.mrf.mxu1 }
 0x197   :  { %612 = vtanh.f32 %v190_v49 }
 0x198   :  { %v192_v50 = vpop.f32.mrf.mxu1 }
 0x199   :  { %614 = vtanh.f32 %v192_v50 }
 0x19a   :  { %v194_v51 = vpop.f32.mrf.mxu1 }
 0x19c   :  { %v195_v52 = vpop.f32.mrf.mxu1 }
 0x1a4   :  { %v613_v53 = vpop.eup %612 }
 0x1a5   :  { %v199_v56 = vpack.c.bf16 %v613_v53, %v613_v53 }
 0x1a6   :  { %v615_v54 = vpop.eup %614 }
 0x1a7   :  { %v200_v55 = vpack.c.bf16 %v615_v54, %v615_v54 }
 0x1a9   :  { %505 = vmatprep.mubr.msk.bf16.mxu0 %vm325_vm5, %v200_v55 }
 0x1aa   :  { %368 = vmatmul.mubr.bf16.vlgmr.msra.gmra.mxu0 %v199_v56 }
 0x26a   :  { %v531_v62 = vpop.f32.mrf.mxu0 }
 0x26c   :  { %v532_v63 = vpop.f32.mrf.mxu0 }
 0x26d   :  { %v533_v1 = vadd.f32 %v532_v63, %v531_v62 }
 0x26e   :  { %v534_v2 = vpop.f32.mrf.mxu0 }
 0x26f   :  { %616 = vtanh.f32 %v533_v1 }
 0x270   :  { %v535_v3 = vpop.f32.mrf.mxu0 }
 0x27c   :  { %v617_v4 = vpop.eup %616 }
 0x27d   :  { %v376_v5 = vpack.c.bf16 %v617_v4, %v617_v4 }
 0x27f   :  { %563 = vmatmul.mubr.msk.bf16.vlgmr.msra.gmra.mxu1 %vm143_vm4, %v376_v5 }
 0x33f   :  { %v461_v6 = vpop.f32.mrf.mxu1 }
 0x340   :  { %618 = vtanh.f32 %v461_v6 }
 0x341   :  { %v564_v7 = vpop.f32.mrf.mxu1 }
 0x343   :  { %v464_v8 = vpop.f32.mrf.mxu1 }
 0x345   :  { %v565_v0 = vpop.f32.mrf.mxu1 }
 0x34d   :  { %v619_v9 = vpop.eup %618 }
 0x34e   :  { %469 = vst.msk [vmem:[%s782_s5] sm:$0xff] %vm468_vm6, %v619_v9 }

</bundles_post_ra>
